<compile_context>
chip_gen: v6e
topology: v6e:2x2x1
jax: 0.10.0
libtpu: 0.0.40
codegen_flags: <defaults>
</compile_context>

<pallas_src>
import jax
import jax.numpy as jnp
from jax.experimental import pallas as pl
from jax.experimental.pallas import tpu as pltpu


def _pick_fold(hw: int, c: int) -> int:
    """Smallest divisor f of H*W such that f*C is a multiple of 128 (lane-dense).

    Falls back to the smallest divisor with f*C >= 128, else 1.
    """
    if c >= 128:
        return 1
    best_ge = None
    for f in range(1, hw + 1):
        if hw % f:
            continue
        fc = f * c
        if fc % 128 == 0:
            return f
        if best_ge is None and fc >= 128:
            best_ge = f
    return best_ge if best_ge is not None else 1


def _make_grn_kernel(fold: int, channels: int, eps: float):
    """Builds the GRN kernel for x viewed as (B_tile, S, fold*channels)."""

    def kernel(x_ref, gamma_ref, beta_ref, o_ref):
        # ---- Pass 1: per-logical-channel sum of squares (f32 accumulation). ----
        xf = x_ref[...].astype(jnp.float32)                     # (B, S, F*C)
        ssq = jnp.sum(xf * xf, axis=1, keepdims=True)           # (B, 1, F*C)
        # Group-sum the `fold` spatial positions folded into the lane axis so
        # only the C logical channels are reduced together (F-1 tiny adds).
        gxsq = ssq[:, :, 0:channels]                            # (B, 1, C)
        for f in range(1, fold):
            gxsq = gxsq + ssq[:, :, f * channels:(f + 1) * channels]

        gx = jnp.sqrt(gxsq)                                     # ||x||_2 per chan
        # Mean over the C *logical* channels (explicit divisor, not F*C).
        mean_gx = jnp.sum(gx, axis=-1, keepdims=True) * (1.0 / channels)
        nx = gx / (mean_gx + eps)                               # (B, 1, C) exact;
        # tiny tensor, so the exact divide costs nothing vs approx reciprocal.

        gamma = gamma_ref[...].astype(jnp.float32)              # (1, 1, C)
        beta = beta_ref[...].astype(jnp.float32)                # (1, 1, C)
        scale = gamma * nx + 1.0                                # (B, 1, C)
        if fold > 1:
            scale = jnp.tile(scale, (1, 1, fold))               # (B, 1, F*C)
            beta = jnp.tile(beta, (1, 1, fold))                 # (1, 1, F*C)

        # ---- Pass 2: one FMA per element; re-read x so the pass-1 f32 copy
        # is not kept live across the whole body. ----
        # TODO(synk): for bf16 inputs on v6e/v7x this pass could run in bf16
        # (2x vreg density); kept in f32 so the same code is exact on v5e.
        x2 = x_ref[...].astype(jnp.float32)
        o_ref[...] = (x2 * scale + beta).astype(o_ref.dtype)

    return kernel


def grn_pallas(x, gamma, beta, *, eps=1e-6,
               vmem_block_budget_bytes=4 * 1024 * 1024):
    """GRN forward. x: (N, H, W, C) NHWC; gamma, beta: (1, 1, 1, C)."""
    N, H, W, C = x.shape

    # Fold just enough spatial positions into the lane axis to be lane-dense.
    fold = _pick_fold(H * W, C)
    S = (H * W) // fold
    FC = fold * C

    x3 = x.reshape(N, S, FC)            # contiguous reshape, no copy
    gamma3 = gamma.reshape(1, 1, C)
    beta3 = beta.reshape(1, 1, C)

    # Images per grid step: big enough to amortize ~0.35us/step overhead, small
    # enough that double-buffered in+out blocks fit v7x VMEM, and (when N >= 2)
    # keep at least 2 grid steps so both v7x TensorCores are used.
    bytes_per_image = H * W * C * x.dtype.itemsize
    bt = max(1, min(N, vmem_block_budget_bytes // max(1, bytes_per_image)))
    if N >= 2:
        bt = min(bt, max(1, N // 2))
    while N % bt != 0:                  # bt must evenly divide N
        bt -= 1
    grid = (N // bt,)
    # TODO(synk): for very large H*W*C a single image block could exceed VMEM;
    # that case needs a two-phase spatial-split kernel (reduce pass + apply pass).

    kernel = _make_grn_kernel(fold, C, eps)

    out3 = pl.pallas_call(
        kernel,
        out_shape=jax.ShapeDtypeStruct((N, S, FC), x.dtype),
        grid_spec=pltpu.PrefetchScalarGridSpec(
            num_scalar_prefetch=0,
            grid=grid,
            in_specs=[
                pl.BlockSpec((bt, S, FC), lambda b: (b, 0, 0)),
                pl.BlockSpec((1, 1, C), lambda b: (0, 0, 0)),
                pl.BlockSpec((1, 1, C), lambda b: (0, 0, 0)),
            ],
            out_specs=pl.BlockSpec((bt, S, FC), lambda b: (b, 0, 0)),
        ),
        compiler_params=pltpu.CompilerParams(
            dimension_semantics=("parallel",),
        ),
    )(x3, gamma3, beta3)

    return out3.reshape(N, H, W, C)


def grn_reference(x, gamma, beta):
    """Pure-JAX reference matching the PyTorch forward exactly."""
    xf = x.astype(jnp.float32)
    gx = jnp.sqrt(jnp.sum(xf * xf, axis=(1, 2), keepdims=True))
    nx = gx / (jnp.mean(gx, axis=-1, keepdims=True) + 1e-6)
    return (gamma.astype(jnp.float32) * (xf * nx)
            + beta.astype(jnp.float32) + xf).astype(x.dtype)


if __name__ == "__main__":
    # Small shapes consistent with the module: batch=2, spatial=16x16, dim=32.
    N, H, W, C = 2, 16, 16, 32
    key = jax.random.PRNGKey(0)
    kx, kg, kb = jax.random.split(key, 3)

    x = jax.random.normal(kx, (N, H, W, C), dtype=jnp.float32)
    # Module __init__ uses zeros(1,1,1,dim); use small random values so the
    # normalization path is actually exercised.
    gamma = 0.1 * jax.random.normal(kg, (1, 1, 1, C), dtype=jnp.float32)
    beta = 0.1 * jax.random.normal(kb, (1, 1, 1, C), dtype=jnp.float32)

    out = grn_pallas(x, gamma, beta)
    out = jax.block_until_ready(out)

    ref = grn_reference(x, gamma, beta)
    assert out.shape == (N, H, W, C)
    # Exact divide in-kernel; remaining difference is only f32 summation order.
    assert jnp.allclose(out, ref, atol=1e-4, rtol=1e-4), "mismatch vs reference"

    print("KERNEL_OK")
</pallas_src>

<mosaic_0001>
module attributes {stable_mosaic.version = 11 : i64} {
  func.func @kernel(%arg0: i32, %arg1: memref<1x64x128xf32, #tpu.memory_space<vmem>>, %arg2: memref<1x1x32xf32, #tpu.memory_space<vmem>>, %arg3: memref<1x1x32xf32, #tpu.memory_space<vmem>>, %arg4: memref<1x64x128xf32, #tpu.memory_space<vmem>>) attributes {dimension_semantics = [#tpu.dimension_semantics<parallel>], iteration_bounds = array<i64: 2>, scalar_prefetch = 0 : i64, scratch_operands = 0 : i64, tpu.core_type = #tpu.core_type<tc>, window_params = [{transform_indices = @transform_0, window_bounds = array<i64: 1, 64, 128>}, {pipeline_mode = #tpu.pipeline_mode<synchronous>, transform_indices = @transform_1, window_bounds = array<i64: 1, 1, 32>}, {pipeline_mode = #tpu.pipeline_mode<synchronous>, transform_indices = @transform_2, window_bounds = array<i64: 1, 1, 32>}, {transform_indices = @transform_3, window_bounds = array<i64: 1, 64, 128>}]} {
    %c0 = arith.constant 0 : index
    %c0_0 = arith.constant 0 : index
    %c0_1 = arith.constant 0 : index
    %0 = vector.load %arg1[%c0, %c0_0, %c0_1] : memref<1x64x128xf32, #tpu.memory_space<vmem>>, vector<1x64x128xf32>
    %1 = arith.mulf %0, %0 : vector<1x64x128xf32>
    %cst = arith.constant dense<0.000000e+00> : vector<1x128xf32>
    %2 = vector.multi_reduction <add>, %1, %cst [1] : vector<1x64x128xf32> to vector<1x128xf32>
    %3 = vector.shape_cast %2 : vector<1x128xf32> to vector<1x1x128xf32>
    %4 = vector.extract_strided_slice %3 {offsets = [0, 0, 0], sizes = [1, 1, 32], strides = [1, 1, 1]} : vector<1x1x128xf32> to vector<1x1x32xf32>
    %5 = vector.extract_strided_slice %3 {offsets = [0, 0, 32], sizes = [1, 1, 32], strides = [1, 1, 1]} : vector<1x1x128xf32> to vector<1x1x32xf32>
    %6 = arith.addf %4, %5 : vector<1x1x32xf32>
    %7 = vector.extract_strided_slice %3 {offsets = [0, 0, 64], sizes = [1, 1, 32], strides = [1, 1, 1]} : vector<1x1x128xf32> to vector<1x1x32xf32>
    %8 = arith.addf %6, %7 : vector<1x1x32xf32>
    %9 = vector.extract_strided_slice %3 {offsets = [0, 0, 96], sizes = [1, 1, 32], strides = [1, 1, 1]} : vector<1x1x128xf32> to vector<1x1x32xf32>
    %10 = arith.addf %8, %9 : vector<1x1x32xf32>
    %11 = math.sqrt %10 : vector<1x1x32xf32>
    %cst_2 = arith.constant dense<0.000000e+00> : vector<1x1xf32>
    %12 = vector.multi_reduction <add>, %11, %cst_2 [2] : vector<1x1x32xf32> to vector<1x1xf32>
    %13 = vector.shape_cast %12 : vector<1x1xf32> to vector<1x1x1xf32>
    %cst_3 = arith.constant 3.125000e-02 : f32
    %14 = vector.broadcast %cst_3 : f32 to vector<1x1x1xf32>
    %15 = arith.mulf %13, %14 : vector<1x1x1xf32>
    %cst_4 = arith.constant 9.99999997E-7 : f32
    %16 = vector.broadcast %cst_4 : f32 to vector<1x1x1xf32>
    %17 = arith.addf %15, %16 : vector<1x1x1xf32>
    %18 = vector.broadcast %17 : vector<1x1x1xf32> to vector<1x1x32xf32>
    %19 = arith.divf %11, %18 : vector<1x1x32xf32>
    %c0_5 = arith.constant 0 : index
    %c0_6 = arith.constant 0 : index
    %c0_7 = arith.constant 0 : index
    %20 = vector.load %arg2[%c0_5, %c0_6, %c0_7] : memref<1x1x32xf32, #tpu.memory_space<vmem>>, vector<1x1x32xf32>
    %c0_8 = arith.constant 0 : index
    %c0_9 = arith.constant 0 : index
    %c0_10 = arith.constant 0 : index
    %21 = vector.load %arg3[%c0_8, %c0_9, %c0_10] : memref<1x1x32xf32, #tpu.memory_space<vmem>>, vector<1x1x32xf32>
    %22 = arith.mulf %20, %19 : vector<1x1x32xf32>
    %cst_11 = arith.constant 1.000000e+00 : f32
    %23 = vector.broadcast %cst_11 : f32 to vector<1x1x32xf32>
    %24 = arith.addf %22, %23 : vector<1x1x32xf32>
    %25 = tpu.concatenate %24, %24, %24, %24 in 2 : vector<1x1x32xf32>, vector<1x1x32xf32>, vector<1x1x32xf32>, vector<1x1x32xf32> -> vector<1x1x128xf32>
    %26 = tpu.concatenate %21, %21, %21, %21 in 2 : vector<1x1x32xf32>, vector<1x1x32xf32>, vector<1x1x32xf32>, vector<1x1x32xf32> -> vector<1x1x128xf32>
    %c0_12 = arith.constant 0 : index
    %c0_13 = arith.constant 0 : index
    %c0_14 = arith.constant 0 : index
    %27 = vector.load %arg1[%c0_12, %c0_13, %c0_14] : memref<1x64x128xf32, #tpu.memory_space<vmem>>, vector<1x64x128xf32>
    %28 = vector.broadcast %25 : vector<1x1x128xf32> to vector<1x64x128xf32>
    %29 = arith.mulf %27, %28 : vector<1x64x128xf32>
    %30 = vector.broadcast %26 : vector<1x1x128xf32> to vector<1x64x128xf32>
    %31 = arith.addf %29, %30 : vector<1x64x128xf32>
    %c0_15 = arith.constant 0 : index
    %c0_16 = arith.constant 0 : index
    %c0_17 = arith.constant 0 : index
    %32 = vector.load %arg4[%c0_15, %c0_16, %c0_17] : memref<1x64x128xf32, #tpu.memory_space<vmem>>, vector<1x64x128xf32>
    tpu.vector_store %arg4[%c0_15, %c0_16, %c0_17], %31 {strides = array<i32>} : memref<1x64x128xf32, #tpu.memory_space<vmem>>, vector<1x64x128xf32>,
    return
  }
  func.func @transform_0(%arg0: i32) -> (i32, i32, i32) {
    %c0_i32 = arith.constant 0 : i32
    %c0_i32_0 = arith.constant 0 : i32
    %c0_i32_1 = arith.constant 0 : i32
    return %arg0, %c0_i32, %c0_i32_0 : i32, i32, i32
  }
  func.func @transform_1(%arg0: i32) -> (i32, i32, i32) {
    %c0_i32 = arith.constant 0 : i32
    %c0_i32_0 = arith.constant 0 : i32
    %c0_i32_1 = arith.constant 0 : i32
    %c0_i32_2 = arith.constant 0 : i32
    return %c0_i32, %c0_i32_0, %c0_i32_1 : i32, i32, i32
  }
  func.func @transform_2(%arg0: i32) -> (i32, i32, i32) {
    %c0_i32 = arith.constant 0 : i32
    %c0_i32_0 = arith.constant 0 : i32
    %c0_i32_1 = arith.constant 0 : i32
    %c0_i32_2 = arith.constant 0 : i32
    return %c0_i32, %c0_i32_0, %c0_i32_1 : i32, i32, i32
  }
  func.func @transform_3(%arg0: i32) -> (i32, i32, i32) {
    %c0_i32 = arith.constant 0 : i32
    %c0_i32_0 = arith.constant 0 : i32
    %c0_i32_1 = arith.constant 0 : i32
    return %arg0, %c0_i32, %c0_i32_0 : i32, i32, i32
  }
}

</mosaic_0001>

<bundles_post_ra>
// kernel: tpu_custom_call.1
= control target key start
LH: loop header
LB: loop body
LE: loop exit
PB: predicated region body
PF: predicated region fallthrough
CT: control target
= control target key end

     0   :  { %8 = vsyncpa [#allocation3], 0  ;;  %s815_s0 = inlined_call_operand.hbm [shape: f32[2,64,128], index: 0, kind: input, shape index: {}]   ;;  %s816_s1 = inlined_call_operand.vmem [shape: f32[1,1,32], index: 1, kind: input, shape index: {}]   ;;  %s817_s2 = inlined_call_operand.vmem [shape: f32[1,1,32], index: 2, kind: input, shape index: {}]   ;;  %s818_s3 = inlined_call_operand.hbm [shape: f32[2,64,128], index: 3, kind: output, shape index: {}]  }
   0x1   :  { %10 = vsyncpa [#allocation3 + $0x1], 0 }
   0x2   :  { %11 = vsyncpa [#allocation4], 0 }
   0x3   :  { %13 = vsyncpa [#allocation4 + $0x1], 0  ;;  %s602_s12 = smov 0   ;;  %s604_s13 = smov 0  }
   0x4   :  { %s606_s14 = smov 0   ;;  %s608_s15 = smov 0  }
   0x5 LB: > { %s623_s16 = sadd.s32 4294967295, %s571_s15   ;;  %s406_s17 = sadd.s32 4294967294, %s571_s15   ;;  %s571_s15 = sphi %s608_s15, %s833_s15   ;;  %s567_s14 = sphi %s606_s14, %s832_s14   ;;  %s563_s13 = sphi %s604_s13, %s831_s13   ;;  %s559_s12 = sphi %s602_s12, %s830_s12  }
   0x6   : > { %s627_s18 = sadd.s32 1, %s571_s15   ;;  %s26_s19 = sadd.s32 1, %s567_s14 }
   0x7   : > { %s23_s20 = ssub.s32 %s571_s15, %s627_s18  ;;  %p33_p0 = scmp.ne.s32.totalorder %s567_s14, %s563_s13 }
   0x8   : > { %p24_p1 = scmp.eq.s32.totalorder %s23_s20, 0  ;;  %p34_p2 = scmp.eq.s32.totalorder %s571_s15, 0 }
   0x9   : > { %p39_p3 = scmp.ne.s32.totalorder %s563_s13, %s559_s12  ;;  %p40_p4 = scmp.eq.s32.totalorder %s623_s16, 0 }
   0xa   : > { %s639_s21 = scalar_select %p24_p1, %s567_s14, %s26_s19  }
   0xb   : > { %p641_p5 = por %p34_p2, %p33_p0  ;;  %p645_p6 = por %p40_p4, %p39_p3 }
   0xc   : > { %p105_p7 = scmp.eq.s32.totalorder %s623_s16, 1  ;;  %p111_p8 = scmp.eq.s32.totalorder %s406_s17, 1 }
   0xd   : > { %s822_s23 = scalar_select %p645_p6, 1, 0 }
   0xe   : > { %p434_p10 = scmp.lt.s32.totalorder %s571_s15, 2  ;;  %p652_p11 = por %p105_p7, %p33_p0 }
   0xf   : > { %p656_p12 = por %p111_p8, %p39_p3  ;;  %s137_s26 = sand.u32 1, %s567_s14  }
  0x10   : > { %s823_s24 = scalar_select %p652_p11, 1, 0 }
  0x11   : > { %s824_s25 = scalar_select %p656_p12, 1, 0 }
  0x12   : > { %s420_s27 = sshll.u32 %s571_s15, 10  ;;  %s409_s28 = sshll.u32 %s137_s26, 6 }
  0x13   : > { %s665_s4 = scalar_lea.hbm %s815_s0, %s420_s27  ;;  %s141_s5 = scalar_lea.vmem [#allocation2], %s409_s28 }
  0x14   : > { %s148_s6 = sshll.u32 %s141_s5, 4  ;;  %p669_p13 = pnand %p434_p10, %p641_p5  ;;  %s673_s6 = int_to_ptr.vmem [resolvable:$true] %s148_s6 }
  0x15   : > { %s675_s8 = scalar_lea.sflag [#allocation3], %s137_s26  ;;  %s479_s9 = scalar_lea.hbm %s665_s4, 1024 }
  0x16   : > { %p480_p0 = scmp.ne.s32.totalorder %s665_s4, %s479_s9  ;;  %p481_p1 = pneg %p669_p13 }
  0x17   : > { %s484_s17 = scalar_lea.hbm %s815_s0, 2048  ;;  %p485_p4 = scmp.lt.s32.totalorder %s665_s4, %s815_s0 }
  0x18   : > { %p482_p2 = pnand %p481_p1, %p480_p0  ;;  %p486_p5 = scmp.lt.s32.totalorder %s484_s17, %s479_s9 }
  0x1a   : > { %p483_p3 = pneg %p482_p2  ;;  %p487_p7 = por %p486_p5, %p485_p4 }
  0x1c   : > { %p488_p8 = pnand %p487_p7, %p483_p3 }
  0x1e   : > { %491 = shalt.err (!%p488_p8)
}
  0x1f   : > { %s492_s22 = scalar_lea.vmem %s673_s6, 1024  ;;  %s573_s26 = smov [#allocation2]  }
  0x20   : > { %p493_p10 = scmp.ne.s32.totalorder %s673_s6, %s492_s22  ;;  %s497_s27 = sshll.u32 %s573_s26, 4  ;;  %s498_s27 = int_to_ptr.vmem [resolvable:$false] %s497_s27 }
  0x21   : > { %s499_s28 = scalar_lea.vmem %s498_s27, 2048  ;;  %p500_p2 = scmp.lt.s32.totalorder %s673_s6, %s498_s27 }
  0x22   : > { %p495_p9 = pnand %p493_p10, %p481_p1  ;;  %p501_p12 = scmp.lt.s32.totalorder %s499_s28, %s492_s22 }
  0x24   : > { %p496_p0 = pneg %p495_p9  ;;  %p502_p11 = por %p501_p12, %p500_p2 }
  0x26   : > { %p503_p6 = pnand %p502_p11, %p496_p0 }
  0x28   : > { %506 = shalt.err (!%p503_p6)
}
  0x29   : > { %s574_s29 = smov 128   ;;  %s575_s30 = smov 8  }
  0x2a   : > { %429 = dma.hbm_to_vmem [thread:$0]  (!%p669_p13), %s665_s4, 1024, %s673_s6, %s675_s8, %s574_s29, %s574_s29, %s575_s30  }
  0x2b   : > { %p412_p9 = scmp.ge.s32.totalorder %s571_s15, 1  ;;  %p156_p1 = scmp.lt.s32.totalorder %s571_s15, 3 }
  0x2d   : > { %p157_p3 = pnand %p412_p9, %p156_p1 }
  0x2e   : > { %s699_s5 = sand.u32 (!%p157_p3), 1, %s563_s13   ;;  %p826_p6 = scmp.ne.s32.totalorder (!%p157_p3), %s822_s23, 0 }
  0x2f   : > { %160 = sbr.rel (%p157_p3) target bundleno = 537 (0x219), region = 32  ;;  %s413_s9 = sshll.u32 (!%p157_p3), %s699_s5, 6 }
  0x30   : > { %s163_s10 = scalar_lea.sflag (!%p157_p3), [#allocation3], %s699_s5  ;;  %s166_s11 = scalar_lea.vmem (!%p157_p3), [#allocation2], %s413_s9 }
  0x34   : > { %550 = dma.done.wait (%p826_p6), %s163_s10, 1024  }
  0x35   : > { %552 = vsyncadd (%p826_p6), %s163_s10, 4294966272  ;;  %v709_v0 = vld [vmem:[%s166_s11] sm:$0xff]  ;;  %v711_v1 = vld [vmem:[%s166_s11 + $0x8] sm:$0xff]  ;;  %s576_s23 = smov 96   ;;  %s577_s4 = smov 32   ;;  %vm238_vm1 = vcmask 253952   ;;  %v251_v41 = vlaneseq }
  0x36   : > { %v713_v2 = vld [vmem:[%s166_s11 + $0x10] sm:$0xff]  ;;  %v715_v3 = vld [vmem:[%s166_s11 + $0x18] sm:$0xff]  ;;  %v197_v4 = vmul.f32 %v709_v0, %v709_v0  ;;  %v198_v5 = vmul.f32 %v711_v1, %v711_v1  ;;  %v723_v7 = vld [vmem:[%s166_s11 + $0x20] sm:$0xff]  ;;  %s578_s6 = smov 64   ;;  %vm264_vm3 = vcmask 261120   ;;  %vm268_vm4 = vcmask 785408  }
  0x37   : > { %v199_v6 = vmul.f32 %v713_v2, %v713_v2  ;;  %v200_v8 = vmul.f32 %v715_v3, %v715_v3  ;;  %v727_v10 = vld [vmem:[%s166_s11 + $0x28] sm:$0xff]  ;;  %v201_v11 = vmul.f32 %v723_v7, %v723_v7  ;;  %v731_v13 = vld [vmem:[%s166_s11 + $0x30] sm:$0xff]  ;;  %v735_v16 = vld [vmem:[%s166_s11 + $0x38] sm:$0xff]  ;;  %v252_v42 = vshrl.u32 %v251_v41, 7  ;;  %s421_s20 = sshll.u32 %s623_s16, 10  ;;  %s188_s22 = scalar_lea.vmem [#allocation5], %s413_s9 }
  0x38   : > { %v205_v9 = vadd.f32 %v198_v5, %v197_v4  ;;  %v202_v14 = vmul.f32 %v727_v10, %v727_v10  ;;  %v203_v17 = vmul.f32 %v731_v13, %v731_v13  ;;  %v204_v19 = vmul.f32 %v735_v16, %v735_v16  ;;  %v247_v43 = vld [vmem:[%s817_s2] sm:$0x1]  ;;  %s333_s26 = sshll.u32 %s188_s22, 4  ;;  %s770_s28 = scalar_lea.hbm %s818_s3, %s421_s20  ;;  %s772_s26 = int_to_ptr.vmem [resolvable:$true] %s333_s26 }
  0x39   : > { %v253_v44 = vsub.s32 0, %v252_v42  ;;  %v246_v50 = vld [vmem:[%s816_s1] sm:$0x1]  ;;  %vm266_vm5 = vcmask 523264   ;;  %s320_s29 = scalar_lea.sflag [#allocation4], %s699_s5  ;;  %s507_s30 = scalar_lea.vmem %s772_s26, 1024 }
  0x3a   : > { %v206_v12 = vadd.f32 %v205_v9, %v199_v6  ;;  %p508_p11 = scmp.ne.s32.totalorder %s772_s26, %s507_s30  ;;  %p827_p12 = scmp.ne.s32.totalorder %s823_s24, 0 }
  0x3b   : > { %v274_v45 = vrot.slane %v247_v43, %v253_v44  ;;  %s579_s9 = smov [#allocation5]  }
  0x3c   : > { %v207_v15 = vadd.f32 %v206_v12, %v200_v8  ;;  %p509_p13 = pnand %p508_p11, %p827_p12  ;;  %s511_s10 = sshll.u32 %s579_s9, 4  ;;  %s512_s10 = int_to_ptr.vmem [resolvable:$false] %s511_s10 }
  0x3d   : > { %s513_s11 = scalar_lea.vmem %s512_s10, 2048  ;;  %p514_p5 = scmp.lt.s32.totalorder %s772_s26, %s512_s10 }
  0x3e   : > { %v208_v18 = vadd.f32 %v207_v15, %v201_v11  ;;  %p510_p4 = pneg %p509_p13  ;;  %p515_p7 = scmp.lt.s32.totalorder %s513_s11, %s507_s30 }
  0x40   : > { %v209_v20 = vadd.f32 %v208_v18, %v202_v14  ;;  %p516_p8 = por %p515_p7, %p514_p5 }
  0x42   : > { %v210_v21 = vadd.f32 %v209_v20, %v203_v17  ;;  %p517_p10 = pnand %p516_p8, %p510_p4 }
  0x44   : > { %v211_v22 = vadd.f32 %v210_v21, %v204_v19 }
  0x46   : > { %v212_v23 = vrot.slane %v211_v22, 4 }
  0x48   : > { %v213_v24 = vadd.f32 %v212_v23, %v211_v22 }
  0x4a   : > { %v214_v25 = vrot.slane %v213_v24, 2 }
  0x4c   : > { %v215_v26 = vadd.f32 %v214_v25, %v213_v24 }
  0x4e   : > { %v216_v27 = vrot.slane %v215_v26, 1 }
  0x50   : > { %v217_v28 = vadd.f32 %v216_v27, %v215_v26 }
  0x52   : > { %219 = vrot.lane.b32.xlu0 %v217_v28, %s576_s23  ;;  %227 = vrot.lane.b32.xlu1 %v217_v28, %s577_s4 }
  0x56   : > { %223 = vrot.lane.b32.xlu0 %v217_v28, %s578_s6 }
  0x5a   : > { %275 = vrot.lane.b32.xlu0 %v274_v45, %s577_s4 }
  0x5e   : > { %278 = vrot.lane.b32.xlu0 %v274_v45, %s578_s6 }
  0xc4   : > { %v220_v29 = vpop.permute.xlu0 %219  ;;  %v228_v32 = vpop.permute.xlu1 %227 }
  0xc5   : > { %v222_v30 = vadd.f32 %v220_v29, %v217_v28 }
  0xc8   : > { %v224_v31 = vpop.permute.xlu0 %223 }
  0xc9   : > { %v226_v33 = vadd.f32 %v224_v31, %v222_v30 }
  0xcb   : > { %v230_v34 = vadd.f32 %v228_v32, %v226_v33 }
  0xcc   : > { %v276_v55 = vpop.permute.xlu0 %275 }
  0xcd   : > { %475 = vrsqrt.f32 %v230_v34  ;;  %vm233_vm0 = vcmp.eq.f32.partialorder %v230_v34, inf  ;;  %v236_v37 = vand.u32 2147483648, %v230_v34  ;;  %vm235_vm2 = vcmp.eq.f32.partialorder %v230_v34, 0.0 }
  0xce   : > { %v284_v63 = vsel %vm264_vm3, %v247_v43, %v276_v55 }
  0xd0   : > { %v279_v56 = vpop.permute.xlu0 %278 }
  0xd1   : > { %v285_v6 = vsel %vm266_vm5, %v284_v63, %v279_v56 }
  0xda   : > { %v476_v35 = vpop.eup %475 }
  0xdb   : > { %v232_v36 = vmul.f32 %v476_v35, %v230_v34 }
  0xdd   : > { %v234_v38 = vsel %vm233_vm0, %v230_v34, %v232_v36 }
  0xde   : > { %v237_v39 = vsel %vm235_vm2, %v236_v37, %v234_v38 }
  0xdf   : > { %v239_v40 = vsel %vm238_vm1, %v237_v39, 0.0 }
  0xe0   : > { %240 = vadd.xlane.f32.xlu1 %v239_v40 }
 0x169   : > { %v241_v46 = vpop.xlane.xlu1 %240 }
 0x16a   : > { %v242_v47 = vmul.f32 0.03125, %v241_v46 }
 0x16c   : > { %v243_v48 = vadd.f32 1e-06, %v242_v47 }
 0x16e   : > { %477 = vrcp.f32 %v243_v48 }
 0x17b   : > { %v478_v49 = vpop.eup %477 }
 0x17c   : > { %v245_v51 = vmul.f32 %v478_v49, %v237_v39 }
 0x17e   : > { %v248_v52 = vmul.f32 %v246_v50, %v245_v51 }
 0x180   : > { %v249_v53 = vadd.f32 1.0, %v248_v52 }
 0x182   : > { %v254_v54 = vrot.slane %v249_v53, %v253_v44 }
 0x184   : > { %255 = vrot.lane.b32.xlu0 %v254_v54, %s577_s4 }
 0x188   : > { %258 = vrot.lane.b32.xlu0 %v254_v54, %s578_s6 }
 0x18c   : > { %261 = vrot.lane.b32.xlu0 %v254_v54, %s576_s23 }
 0x190   : > { %281 = vrot.lane.b32.xlu0 %v274_v45, %s576_s23 }
 0x1f6   : > { %v256_v57 = vpop.permute.xlu0 %255 }
 0x1f7   : > { %v265_v59 = vsel %vm264_vm3, %v249_v53, %v256_v57 }
 0x1fa   : > { %v259_v58 = vpop.permute.xlu0 %258 }
 0x1fb   : > { %v267_v60 = vsel %vm266_vm5, %v265_v59, %v259_v58 }
 0x1fe   : > { %v262_v61 = vpop.permute.xlu0 %261 }
 0x1ff   : > { %v269_v62 = vsel %vm268_vm4, %v267_v60, %v262_v61 }
 0x200   : > { %v290_v4 = vrot.slane %v269_v62, %v253_v44 }
 0x202   : > { %v282_v5 = vpop.permute.xlu0 %281  ;;  %v291_v8 = vmul.f32 %v290_v4, %v709_v0  ;;  %v292_v11 = vmul.f32 %v290_v4, %v711_v1  ;;  %v293_v12 = vmul.f32 %v290_v4, %v713_v2  ;;  %v294_v14 = vmul.f32 %v290_v4, %v715_v3 }
 0x203   : > { %v286_v9 = vsel %vm268_vm4, %v285_v6, %v282_v5  ;;  %v295_v17 = vmul.f32 %v290_v4, %v723_v7  ;;  %v296_v18 = vmul.f32 %v290_v4, %v727_v10  ;;  %v297_v19 = vmul.f32 %v290_v4, %v731_v13 }
 0x204   : > { %v302_v15 = vrot.slane %v286_v9, %v253_v44  ;;  %v298_v0 = vmul.f32 %v290_v4, %v735_v16 }
 0x206   : > { %v303_v20 = vadd.f32 %v302_v15, %v291_v8  ;;  %v304_v21 = vadd.f32 %v302_v15, %v292_v11  ;;  %v305_v22 = vadd.f32 %v302_v15, %v293_v12  ;;  %v306_v23 = vadd.f32 %v302_v15, %v294_v14 }
 0x207   : > { %v307_v1 = vadd.f32 %v302_v15, %v295_v17  ;;  %v308_v2 = vadd.f32 %v302_v15, %v296_v18  ;;  %v309_v3 = vadd.f32 %v302_v15, %v297_v19  ;;  %v310_v7 = vadd.f32 %v302_v15, %v298_v0 }
 0x208   : > { %311 = vst [vmem:[%s188_s22] sm:$0xff] %v303_v20  ;;  %312 = vst [vmem:[%s188_s22 + $0x8] sm:$0xff] %v304_v21 }
 0x209   : > { %313 = vst [vmem:[%s188_s22 + $0x10] sm:$0xff] %v305_v22  ;;  %314 = vst [vmem:[%s188_s22 + $0x18] sm:$0xff] %v306_v23 }
 0x20a   : > { %315 = vst [vmem:[%s188_s22 + $0x20] sm:$0xff] %v307_v1  ;;  %316 = vst [vmem:[%s188_s22 + $0x28] sm:$0xff] %v308_v2 }
 0x20b   : > { %317 = vst [vmem:[%s188_s22 + $0x30] sm:$0xff] %v309_v3  ;;  %318 = vst [vmem:[%s188_s22 + $0x38] sm:$0xff] %v310_v7 }
 0x20c   : > { %520 = shalt.err (!%p517_p10)
}
 0x20d   : > { %s521_s23 = scalar_lea.hbm %s770_s28, 1024  ;;  %s525_s7 = scalar_lea.hbm %s818_s3, 2048 }
 0x20e   : > { %p522_p0 = scmp.ne.s32.totalorder %s770_s28, %s521_s23  ;;  %p526_p1 = scmp.lt.s32.totalorder %s770_s28, %s818_s3 }
 0x20f   : > { %p527_p3 = scmp.lt.s32.totalorder %s525_s7, %s521_s23 }
 0x210   : > { %p523_p2 = pnand %p522_p0, %p827_p12 }
 0x211   : > { %p528_p6 = por %p527_p3, %p526_p1 }
 0x212   : > { %p524_p9 = pneg %p523_p2 }
 0x214   : > { %p529_p11 = pnand %p528_p6, %p524_p9 }
 0x216   : > { %532 = shalt.err (!%p529_p11)
}
 0x217   : > { %s580_s19 = smov 128   ;;  %s581_s20 = smov 8  }
 0x218   : > { %424 = dma.vmem_to_hbm [thread:$0]  (%p827_p12), %s772_s26, 1024, %s770_s28, %s320_s29, %s580_s19, %s580_s19, %s581_s20  }
 0x219 PF: > { %s348_s22 = sand.u32 1, %s559_s12   ;;  %p828_p13 = scmp.ne.s32.totalorder %s824_s25, 0 }
 0x21a   : > { %p829_p4 = scmp.ge.s32.totalorder %s571_s15, 2  ;;  %s349_s16 = scalar_lea.sflag [#allocation4], %s348_s22 }
 0x21c   : > { %p431_p5 = pnand %p829_p4, %p828_p13 }
 0x21e   : > { %p432_p7 = pneg %p431_p5 }
 0x220   : > { %554 = dma.done.wait (%p432_p7), %s349_s16, 1024  }
 0x221   : > { %556 = vsyncadd (%p432_p7), %s349_s16, 4294966272  ;;  %p16_p8 = scmp.ge.s32.totalorder %s627_s18, 4   ;;  %s830_s12 = smov %s563_s13 }
 0x222   : > { %s831_s13 = smov %s567_s14  ;;  %s832_s14 = smov %s639_s21 }
 0x223   : > { %s833_s15 = smov %s627_s18  ;;  %18 = sbr.rel (!%p16_p8) target bundleno = 5 (0x5), region = 77 }
 0x228   :  { %354 = vsyncpa [#allocation3], 1 }
 0x229   :  { %356 = vsyncpa [#allocation3 + $0x1], 1 }
 0x22a   :  { %357 = vsyncpa [#allocation4], 1 }
 0x22b   :  { %359 = vsyncpa [#allocation4 + $0x1], 1 }

</bundles_post_ra>
